<compile_context>
chip_gen: v7x
topology: tpu7x:2x2x1
jax: 0.10.0
libtpu: 0.0.40
codegen_flags: <defaults>
</compile_context>

<pallas_src>
import functools

import jax
import jax.numpy as jnp
from jax.experimental import pallas as pl
from jax.experimental.pallas import tpu as pltpu


def mynet1_kernel(xt_ref, w1tb_ref, w2tb_ref, out_ref):
    # xt_ref   : [F, TB]       input, lane-dense along batch
    # w1tb_ref : [H, F+1]      W1^T with bias1 folded in as the trailing column
    # w2tb_ref : [O_pad, H+1]  W2^T zero-padded to 8 sublanes, bias2 last column
    # out_ref  : [O, TB]       output, lane-dense along batch
    xt = xt_ref[...]
    w1tb = w1tb_ref[...]
    w2tb = w2tb_ref[...]

    f_in = xt.shape[0]
    tb = xt.shape[1]
    hid = w1tb.shape[0]
    o_out = out_ref.shape[0]

    # Layer 1: K = F = 2 contraction on the VPU (MXU would be wasted on K=2).
    # Batch rides the lane axis, so every VALU op uses all 128 lanes.
    h = jnp.broadcast_to(w1tb[:, f_in:f_in + 1], (hid, tb))      # bias1
    for f in range(f_in):                                        # static unroll
        h = h + w1tb[:, f:f + 1] * xt[f:f + 1, :]
    h = jnp.maximum(h, 0.0)                                      # ReLU, f32

    # Layer 2: K = H = 32 contraction as one MXU dot (vector-extended slot)
    # instead of 32 cross-lane broadcasts; output stays lane-dense along batch.
    o = jnp.dot(w2tb[:, :hid], h, preferred_element_type=jnp.float32)
    o = o + w2tb[:, hid:hid + 1]                                 # bias2
    out_ref[...] = o[:o_out, :].astype(out_ref.dtype)


def prepare_params(w1, b1, w2, b2):
    """One-time parameter prep (outside the per-call jit path).

    Returns:
      w1tb: (H, F+1) f32   -- W1^T with bias1 as the trailing column.
      w2tb: (O_pad, H+1) f32 -- W2^T padded to 8 sublanes, bias2 last column.
           Padded rows are zero, so padded output rows are exactly 0.
    """
    f_in, hid = w1.shape
    o_out = w2.shape[1]
    o_pad = ((o_out + 7) // 8) * 8

    w1tb = jnp.concatenate(
        [w1.T.astype(jnp.float32), b1.reshape(hid, 1).astype(jnp.float32)],
        axis=1)

    w2tb = jnp.zeros((o_pad, hid + 1), jnp.float32)
    w2tb = w2tb.at[:o_out, :hid].set(w2.T.astype(jnp.float32))
    w2tb = w2tb.at[:o_out, hid].set(b2.reshape(-1).astype(jnp.float32))
    return w1tb, w2tb


def _pick_tb(batch, block_b):
    # Tiny batches (demo path): one full-array block.
    if batch < 512:
        return batch
    # Lane-aligned tile aiming for >= 2 grid steps so the "parallel" batch
    # axis shards across v7x's two TensorCores; capped at block_b (sweepable).
    tb = min(block_b, (batch // 2 // 128) * 128)
    return max(tb, 128)


@functools.partial(jax.jit, static_argnames=("n_output", "block_b"))
def mynet1_forward(x, w1tb, w2tb, *, n_output, block_b=1024):
    batch, f_in = x.shape
    hid = w1tb.shape[0]
    o_pad = w2tb.shape[0]

    # Lane-dense along batch: one cheap transpose in the wrapper.
    xt = x.astype(jnp.float32).T                     # (F, B)

    tb = _pick_tb(batch, block_b)
    grid = (pl.cdiv(batch, tb),)
    # Note: if batch is not a multiple of tb, the last step reads padded rows
    # of x; rows are independent so this is harmless for this forward pass.

    out_t = pl.pallas_call(
        mynet1_kernel,
        out_shape=jax.ShapeDtypeStruct((n_output, batch), jnp.float32),
        grid=grid,
        in_specs=[
            pl.BlockSpec((f_in, tb), lambda i: (0, i)),        # batch-tiled input
            pl.BlockSpec((hid, f_in + 1), lambda i: (0, 0)),   # VMEM-resident weights
            pl.BlockSpec((o_pad, hid + 1), lambda i: (0, 0)),
        ],
        out_specs=pl.BlockSpec((n_output, tb), lambda i: (0, i)),
        compiler_params=pltpu.CompilerParams(
            dimension_semantics=("parallel",)),
    )(xt, w1tb, w2tb)

    return out_t.T                                   # (B, O), no padded slice


def init_linear_params(key, fan_in, fan_out):
    # Deterministic init mimicking nn.Linear's U(-1/sqrt(fan_in), 1/sqrt(fan_in)).
    kw, kb = jax.random.split(key)
    bound = 1.0 / jnp.sqrt(jnp.float32(fan_in))
    w = jax.random.uniform(kw, (fan_in, fan_out), jnp.float32, -bound, bound)
    b = jax.random.uniform(kb, (1, fan_out), jnp.float32, -bound, bound)
    return w, b


if __name__ == "__main__":
    key = jax.random.PRNGKey(0)
    k_x, k_l1, k_l2 = jax.random.split(key, 3)

    # Shapes implied by the reference script: 2 input features, 2 output classes.
    n_feature, n_hidden, n_output = 2, 32, 2
    batch = 8

    # Synthetic input akin to the two Gaussian blobs in the original script.
    centers = jnp.where(jnp.arange(batch)[:, None] < batch // 2, 2.0, -2.0)
    x = centers + jax.random.normal(k_x, (batch, n_feature), jnp.float32)

    w1, b1 = init_linear_params(k_l1, n_feature, n_hidden)
    w2, b2 = init_linear_params(k_l2, n_hidden, n_output)

    # Fold/transpose/pad weights once (static across calls).
    w1tb, w2tb = prepare_params(w1, b1, w2, b2)

    out = mynet1_forward(x, w1tb, w2tb, n_output=n_output)
    jax.block_until_ready(out)

    # Cross-check against plain JAX reference of the PyTorch forward.
    ref = jnp.maximum(x @ w1 + b1, 0.0) @ w2 + b2
    assert out.shape == ref.shape
    assert jnp.allclose(out, ref, atol=1e-5, rtol=1e-5)

    print("KERNEL_OK")
</pallas_src>

<mosaic_0001>
module attributes {stable_mosaic.version = 11 : i64} {
  func.func @mynet1_kernel(%arg0: i32, %arg1: memref<2x8xf32, #tpu.memory_space<vmem>>, %arg2: memref<32x3xf32, #tpu.memory_space<vmem>>, %arg3: memref<8x33xf32, #tpu.memory_space<vmem>>, %arg4: memref<2x8xf32, #tpu.memory_space<vmem>>) attributes {dimension_semantics = [#tpu.dimension_semantics<parallel>], iteration_bounds = array<i64: 1>, scalar_prefetch = 0 : i64, scratch_operands = 0 : i64, tpu.core_type = #tpu.core_type<tc>, window_params = [{transform_indices = @transform_0, window_bounds = array<i64: 2, 8>}, {pipeline_mode = #tpu.pipeline_mode<synchronous>, transform_indices = @transform_1, window_bounds = array<i64: 32, 3>}, {pipeline_mode = #tpu.pipeline_mode<synchronous>, transform_indices = @transform_2, window_bounds = array<i64: 8, 33>}, {transform_indices = @transform_3, window_bounds = array<i64: 2, 8>}]} {
    %c0 = arith.constant 0 : index
    %c0_0 = arith.constant 0 : index
    %0 = vector.load %arg1[%c0, %c0_0] : memref<2x8xf32, #tpu.memory_space<vmem>>, vector<2x8xf32>
    %c0_1 = arith.constant 0 : index
    %c0_2 = arith.constant 0 : index
    %1 = vector.load %arg2[%c0_1, %c0_2] : memref<32x3xf32, #tpu.memory_space<vmem>>, vector<32x3xf32>
    %c0_3 = arith.constant 0 : index
    %c0_4 = arith.constant 0 : index
    %2 = vector.load %arg3[%c0_3, %c0_4] : memref<8x33xf32, #tpu.memory_space<vmem>>, vector<8x33xf32>
    %3 = vector.extract_strided_slice %1 {offsets = [0, 2], sizes = [32, 1], strides = [1, 1]} : vector<32x3xf32> to vector<32x1xf32>
    %4 = vector.shape_cast %3 : vector<32x1xf32> to vector<32x1xf32>
    %5 = vector.broadcast %4 : vector<32x1xf32> to vector<32x8xf32>
    %6 = vector.extract_strided_slice %1 {offsets = [0, 0], sizes = [32, 1], strides = [1, 1]} : vector<32x3xf32> to vector<32x1xf32>
    %7 = vector.extract_strided_slice %0 {offsets = [0, 0], sizes = [1, 8], strides = [1, 1]} : vector<2x8xf32> to vector<1x8xf32>
    %8 = vector.broadcast %6 : vector<32x1xf32> to vector<32x8xf32>
    %9 = vector.broadcast %7 : vector<1x8xf32> to vector<32x8xf32>
    %10 = arith.mulf %8, %9 : vector<32x8xf32>
    %11 = arith.addf %5, %10 : vector<32x8xf32>
    %12 = vector.extract_strided_slice %1 {offsets = [0, 1], sizes = [32, 1], strides = [1, 1]} : vector<32x3xf32> to vector<32x1xf32>
    %13 = vector.extract_strided_slice %0 {offsets = [1, 0], sizes = [1, 8], strides = [1, 1]} : vector<2x8xf32> to vector<1x8xf32>
    %14 = vector.broadcast %12 : vector<32x1xf32> to vector<32x8xf32>
    %15 = vector.broadcast %13 : vector<1x8xf32> to vector<32x8xf32>
    %16 = arith.mulf %14, %15 : vector<32x8xf32>
    %17 = arith.addf %11, %16 : vector<32x8xf32>
    %cst = arith.constant 0.000000e+00 : f32
    %18 = vector.broadcast %cst : f32 to vector<32x8xf32>
    %19 = arith.maximumf %17, %18 : vector<32x8xf32>
    %20 = vector.extract_strided_slice %2 {offsets = [0, 0], sizes = [8, 32], strides = [1, 1]} : vector<8x33xf32> to vector<8x32xf32>
    %cst_5 = arith.constant dense<0.000000e+00> : vector<8x8xf32>
    %21 = tpu.matmul %20, %19, %cst_5 {dimension_numbers = #tpu.dot_dimension_numbers<[1], [0], [0], [1], [0, 0, 1, 1], [], []>} : vector<8x32xf32>, vector<32x8xf32>, vector<8x8xf32> -> vector<8x8xf32>
    %22 = vector.extract_strided_slice %2 {offsets = [0, 32], sizes = [8, 1], strides = [1, 1]} : vector<8x33xf32> to vector<8x1xf32>
    %23 = vector.broadcast %22 : vector<8x1xf32> to vector<8x8xf32>
    %24 = arith.addf %21, %23 : vector<8x8xf32>
    %25 = vector.extract_strided_slice %24 {offsets = [0, 0], sizes = [2, 8], strides = [1, 1]} : vector<8x8xf32> to vector<2x8xf32>
    %c0_6 = arith.constant 0 : index
    %c0_7 = arith.constant 0 : index
    %26 = vector.load %arg4[%c0_6, %c0_7] : memref<2x8xf32, #tpu.memory_space<vmem>>, vector<2x8xf32>
    tpu.vector_store %arg4[%c0_6, %c0_7], %25 {strides = array<i32>} : memref<2x8xf32, #tpu.memory_space<vmem>>, vector<2x8xf32>,
    return
  }
  func.func @transform_0(%arg0: i32) -> (i32, i32) {
    %c0_i32 = arith.constant 0 : i32
    %c0_i32_0 = arith.constant 0 : i32
    return %c0_i32, %arg0 : i32, i32
  }
  func.func @transform_1(%arg0: i32) -> (i32, i32) {
    %c0_i32 = arith.constant 0 : i32
    %c0_i32_0 = arith.constant 0 : i32
    %c0_i32_1 = arith.constant 0 : i32
    return %c0_i32, %c0_i32_0 : i32, i32
  }
  func.func @transform_2(%arg0: i32) -> (i32, i32) {
    %c0_i32 = arith.constant 0 : i32
    %c0_i32_0 = arith.constant 0 : i32
    %c0_i32_1 = arith.constant 0 : i32
    return %c0_i32, %c0_i32_0 : i32, i32
  }
  func.func @transform_3(%arg0: i32) -> (i32, i32) {
    %c0_i32 = arith.constant 0 : i32
    %c0_i32_0 = arith.constant 0 : i32
    return %c0_i32, %arg0 : i32, i32
  }
}

</mosaic_0001>

<bundles_post_ra>
// kernel: mynet1_forward.1
= control target key start
LH: loop header
LB: loop body
LE: loop exit
PB: predicated region body
PF: predicated region fallthrough
CT: control target
= control target key end

     0   :  { %v259_v1 = vmov 0   ;;  %v260_v2 = vmov 2   ;;  %s317_s0 = inlined_call_operand.vmem [shape: f32[2,8], index: 0, kind: input, shape index: {}]   ;;  %s318_s1 = inlined_call_operand.vmem [shape: f32[32,3], index: 1, kind: input, shape index: {}]   ;;  %s319_s2 = inlined_call_operand.vmem [shape: f32[8,33], index: 2, kind: input, shape index: {}]   ;;  %s320_s3 = inlined_call_operand.hbm [shape: f32[2,8], index: 3, kind: output, shape index: {}]  }
   0x1   :  { %v16_v0 = vld [vmem:[%s318_s1] sm:$0xff]  ;;  %226 = vset.pattern.permute.xlu0 %v259_v1  ;;  %227 = vset.pattern.permute.xlu1 %v260_v2 }
   0x2   :  { %8 = vsyncpa [#allocation3], 0  ;;  %23 = vperm.xlu1 %227, %v16_v0   ;;  %42 = vperm.xlu0 %226, %v16_v0   ;;  %v17_v3 = vld [vmem:[%s318_s1 + $0x8] sm:$0xff]  ;;  %v19_v4 = vld [vmem:[%s318_s1 + $0x18] sm:$0xff]  ;;  %v261_v5 = vmov 1   ;;  %v262_v7 = vmov 0.0|0.0   ;;  %v57_v11 = vlaneseq }
   0x3   :  { %v18_v6 = vld [vmem:[%s318_s1 + $0x10] sm:$0xff]  ;;  %212 = vmatprep.subr.bf16.mxu0 %v262_v7  ;;  %vm263_vm0 = vmmov 0   ;;  %v264_v8 = vmov 0.0   ;;  %v20_v9 = vld [vmem:[%s319_s2] sm:$0xff]  ;;  %v265_v10 = vmov 32   ;;  %vm106_vm1 = vcmask 261120  }
   0x4   :  { %209 = vmatprep.mubr.msk.f32.mxu0 %vm263_vm0, %v264_v8  ;;  %v58_v12 = vshrl.u32 %v57_v11, 7  ;;  %v15_v17 = vld [vmem:[%s317_s0] sm:$0x3]  ;;  %s266_s0 = smov [#allocation2]   ;;  %vm179_vm2 = vcmask 58368  }
   0x5   :  { %s187_s2 = sshll.u32 %s266_s0, 4  ;;  %s188_s2 = int_to_ptr.vmem [resolvable:$true] %s187_s2 }
   0x6   :  { %28 = vperm.xlu1 %227, %v17_v3   ;;  %46 = vperm.xlu0 %226, %v17_v3   ;;  %v59_v15 = vsub.s32 0, %v58_v12  ;;  %v87_v16 = vsub.s32 1, %v58_v12  ;;  %s235_s23 = scalar_lea.vmem %s188_s2, 32  ;;  %p240_p1 = scmp.lt.s32.totalorder %s188_s2, %s188_s2 }
   0x7   :  { %p236_p0 = scmp.ne.s32.totalorder %s188_s2, %s235_s23  ;;  %p241_p2 = scmp.lt.s32.totalorder %s235_s23, %s235_s23 }
   0x8   :  { %v60_v20 = vrot.slane %v15_v17, %v59_v15  ;;  %v88_v21 = vrot.slane %v15_v17, %v87_v16 }
   0x9   :  { %p242_p3 = por %p241_p2, %p240_p1 }
   0xa   :  { %228 = vset.pattern.permute.xlu1 %v261_v5  ;;  %54 = vperm.xlu0 %226, %v19_v4  }
   0xb   :  { %74 = vperm.xlu1 %228, %v17_v3   ;;  %p243_p4 = pnand %p242_p3, %p236_p0 }
   0xe   :  { %230 = vset.pattern.permute.xlu0 %v261_v5 }
   0xf   :  { %229 = vset.pattern.permute.xlu1 %v259_v1  ;;  %70 = vperm.xlu0 %230, %v16_v0  }
  0x10   :  { %50 = vperm.xlu1 %229, %v18_v6  }
  0x13   :  { %78 = vperm.xlu0 %230, %v18_v6  }
  0x14   :  { %231 = vset.pattern.permute.xlu1 %v260_v2 }
  0x15   :  { %33 = vperm.xlu1 %231, %v18_v6  }
  0x17   :  { %234 = vset.pattern.permute.xlu0 %v265_v10 }
  0x19   :  { %38 = vperm.xlu1 %231, %v19_v4  }
  0x1d   :  { %232 = vset.pattern.permute.xlu1 %v261_v5 }
  0x1e   :  { %82 = vperm.xlu1 %232, %v19_v4  }
  0x22   :  { %233 = vset.pattern.permute.xlu1 %v265_v10 }
  0x23   :  { %103 = vperm.xlu1 %233, %v20_v9  }
  0x81   :  { %v24_v13 = vpop.permute.xlu1 %23  ;;  %v43_v14 = vpop.permute.xlu0 %42 }
  0x82   :  { %v61_v25 = vmul.f32 %v60_v20, %v43_v14 }
  0x84   :  { %v65_v29 = vadd.f32 %v61_v25, %v24_v13 }
  0x85   :  { %v29_v18 = vpop.permute.xlu1 %28  ;;  %v47_v19 = vpop.permute.xlu0 %46 }
  0x86   :  { %v62_v22 = vmul.f32 %v60_v20, %v47_v19 }
  0x88   :  { %v66_v27 = vadd.f32 %v62_v22, %v29_v18 }
  0x89   :  { %v55_v23 = vpop.permute.xlu0 %54 }
  0x8a   :  { %v75_v24 = vpop.permute.xlu1 %74  ;;  %v64_v43 = vmul.f32 %v60_v20, %v55_v23 }
  0x8b   :  { %v90_v26 = vmul.f32 %v88_v21, %v75_v24 }
  0x8d   :  { %v94_v30 = vadd.f32 %v90_v26, %v66_v27 }
  0x8e   :  { %v71_v28 = vpop.permute.xlu0 %70 }
  0x8f   :  { %v89_v31 = vmul.f32 %v88_v21, %v71_v28  ;;  %v51_v32 = vpop.permute.xlu1 %50  ;;  %v98_v34 = vmax.f32 %v94_v30, 0.0 }
  0x90   :  { %v63_v39 = vmul.f32 %v60_v20, %v51_v32 }
  0x91   :  { %v93_v33 = vadd.f32 %v89_v31, %v65_v29 }
  0x92   :  { %v79_v38 = vpop.permute.xlu0 %78 }
  0x93   :  { %v97_v35 = vmax.f32 %v93_v33, 0.0  ;;  %v91_v42 = vmul.f32 %v88_v21, %v79_v38 }
  0x94   :  { %v34_v36 = vpop.permute.xlu1 %33 }
  0x95   :  { %v213_v37 = vpack.c.bf16 %v98_v34, %v97_v35  ;;  %v67_v41 = vadd.f32 %v63_v39, %v34_v36 }
  0x97   :  { %214 = vmatpush3.bf16.msra.mxu0 %v213_v37  ;;  %v95_v45 = vadd.f32 %v91_v42, %v67_v41 }
  0x98   :  { %v39_v40 = vpop.permute.xlu1 %38  ;;  %215 = vmatprep.subr.bf16.mxu0 %v262_v7 }
  0x99   :  { %v68_v46 = vadd.f32 %v64_v43, %v39_v40  ;;  %v99_v49 = vmax.f32 %v95_v45, 0.0 }
  0x9d   :  { %v83_v44 = vpop.permute.xlu1 %82 }
  0x9e   :  { %v92_v47 = vmul.f32 %v88_v21, %v83_v44 }
  0xa0   :  { %v96_v48 = vadd.f32 %v92_v47, %v68_v46 }
  0xa2   :  { %v100_v50 = vmax.f32 %v96_v48, 0.0  ;;  %v104_v52 = vpop.permute.xlu1 %103 }
  0xa4   :  { %v216_v51 = vpack.c.bf16 %v100_v50, %v99_v49 }
  0xa6   :  { %217 = vmatpush3.bf16.msra.mxu0 %v216_v51 }
  0xa9   :  { %210 = vmatmul.mubr.msk.f32.vlgmr.msra.gmra.mrb[0].mxu0 %vm106_vm1, %v20_v9 }
 0x17c   :  { %v175_v53 = vpop.f32.mrb[0].mxu0 }
 0x17d   :  { %v176_v54 = vadd.f32 %v175_v53, %v104_v52  ;;  %v211_v55 = vpop.f32.mrb[1].mxu0 }
 0x17f   :  { %180 = vst.msk [vmem:[#allocation2] sm:$0x3] %vm179_vm2, %v176_v54 }
 0x180   :  { %246 = shalt.err (!%p243_p4)
}
 0x181   :  { %s247_s26 = scalar_lea.hbm %s320_s3, 32 }
 0x182   :  { %p248_p5 = scmp.ne.s32.totalorder %s320_s3, %s247_s26  ;;  %p251_p6 = scmp.lt.u32.totalorder %s247_s26, %s320_s3 }
 0x184   :  { %p253_p7 = pnand %p251_p6, %p248_p5 }
 0x186   :  { %256 = shalt.err (!%p253_p7)
}
 0x187   :  { %190 = dma.vmem_to_hbm [thread:$0]  %s188_s2, 32, %s320_s3, [#allocation3]  }
 0x188   :  { %257 = dma.done.wait [#allocation3], 32  }
 0x189   :  { %258 = vsyncadd [#allocation3], 4294967264 }
 0x18a   :  { %194 = vsyncpa [#allocation3], 1 }

</bundles_post_ra>
